<compile_context>
chip_gen: v7x
topology: tpu7x:2x2x1
jax: 0.10.0
libtpu: 0.0.40
codegen_flags: <defaults>
</compile_context>

<pallas_src>
import functools
import math

import numpy as np
import jax
import jax.numpy as jnp
from jax.experimental import pallas as pl
from jax.experimental.pallas import tpu as pltpu


def mha_kernel(x_ref, wqkv_ref, bqkv_ref, wo_ref, bo_ref, o_ref, *,
               num_heads, head_dim, seq_len, block_b):
    """Grid step (i, h): batch-block i, head h.

    x_ref:    (block_b*N, E) bf16 — resident across the h axis.
    wqkv_ref: (1, E, 3d)     bf16 — head h's fused [q|k|v] projection columns
                                    (1/sqrt(emb_size) pre-folded into q cols).
    bqkv_ref: (1, 1, 3d)     f32
    wo_ref:   (1, d, E)      bf16 — head h's row-slice of W_o^T.
    bo_ref:   (1, E)         f32
    o_ref:    (block_b*N, E) f32  — doubles as the cross-head accumulator.
    """
    h = pl.program_id(1)
    d, N = head_dim, seq_len
    rows = block_b * N

    @pl.when(h == 0)
    def _():
        o_ref[...] = jnp.zeros_like(o_ref)

    x = x_ref[...]                                                  # (rows, E) bf16
    qkv = jnp.dot(x, wqkv_ref[0],
                  preferred_element_type=jnp.float32) + bqkv_ref[0]  # (rows, 3d) f32

    q = qkv[:, :d].reshape(block_b, N, d)       # scale already folded into W_q / b_q
    k = qkv[:, d:2 * d].reshape(block_b, N, d)
    v = qkv[:, 2 * d:].reshape(block_b, N, d)

    # Per-head energy only: live N^2 tensor is block_b*N^2, not block_b*H*N^2.
    energy = jnp.einsum('bnd,bmd->bnm', q, k,
                        preferred_element_type=jnp.float32)          # (block_b, N, N)

    m = jnp.max(energy, axis=-1, keepdims=True)
    p = jnp.exp(energy - m)
    denom = jnp.sum(p, axis=-1, keepdims=True)

    # Deferred normalization: P@V on the bf16 MXU first, then scale the (N, d)
    # context — O(N*d) VPU work instead of O(N^2).
    ctx = jnp.einsum('bnm,bmd->bnd',
                     p.astype(jnp.bfloat16), v.astype(jnp.bfloat16),
                     preferred_element_type=jnp.float32)             # (block_b, N, d)
    ctx = ctx * pl.reciprocal(denom, approx=True)

    # Per-head slice of the output projection; the sum over heads equals the
    # full ctx @ W_o^T of the PyTorch module.  Accumulate into the resident
    # f32 output block.
    ctx2d = ctx.reshape(rows, d).astype(jnp.bfloat16)
    o_ref[...] += jnp.dot(ctx2d, wo_ref[0], preferred_element_type=jnp.float32)

    @pl.when(h == pl.num_programs(1) - 1)
    def _():
        o_ref[...] = o_ref[...] + bo_ref[...]


def prepare_attention_params(params, *, num_heads):
    """Hoisted (once-per-model) fusion of the four PyTorch Linear layers.

    Returns MXU-ready, per-head weight slabs:
      w_qkv: (H, E, 3d) bf16 — columns [q_h | k_h | v_h]; 1/sqrt(E) folded into q.
      b_qkv: (H, 1, 3d) f32
      w_o:   (H, d, E)  bf16 — head-h rows of W_o^T, so sum_h ctx_h @ w_o[h] == ctx @ W_o^T.
      b_o:   (1, E)     f32
    """
    E = params["wq"].shape[0]
    H = num_heads
    d = E // H
    scale = 1.0 / math.sqrt(E)   # module divides energy by sqrt(emb_size), NOT sqrt(d)

    wq = (params["wq"].T * scale).reshape(E, H, d)
    wk = params["wk"].T.reshape(E, H, d)
    wv = params["wv"].T.reshape(E, H, d)
    w_qkv = jnp.transpose(jnp.concatenate([wq, wk, wv], axis=-1), (1, 0, 2))  # (H, E, 3d)

    bq = (params["bq"] * scale).reshape(H, 1, d)
    bk = params["bk"].reshape(H, 1, d)
    bv = params["bv"].reshape(H, 1, d)
    b_qkv = jnp.concatenate([bq, bk, bv], axis=-1)                            # (H, 1, 3d)

    return {
        "w_qkv": w_qkv.astype(jnp.bfloat16),
        "b_qkv": b_qkv.astype(jnp.float32),
        "w_o": params["wo"].T.reshape(H, d, E).astype(jnp.bfloat16),
        "b_o": params["bo"].reshape(1, E).astype(jnp.float32),
    }


def multi_head_attention(x, fused, *, num_heads, block_b=None):
    """x: (B, N, E) float32.  fused: output of prepare_attention_params."""
    B, N, E = x.shape
    assert E % num_heads == 0
    d = E // num_heads

    if block_b is None:
        # Target ~8 batch blocks on the "parallel" grid axis: enough steps for
        # DMA/compute overlap and >1 step per v7x TensorCore.
        block_b = max(1, pl.cdiv(B, 8))
    num_blocks = pl.cdiv(B, block_b)
    b_pad = num_blocks * block_b
    rows = block_b * N

    x2d = x.reshape(B * N, E)
    if b_pad != B:
        # Zero-pad to a whole number of blocks (zeros are NaN-safe through softmax).
        x2d = jnp.pad(x2d, ((0, (b_pad - B) * N), (0, 0)))
    x2d = x2d.astype(jnp.bfloat16)

    kernel = functools.partial(mha_kernel, num_heads=num_heads, head_dim=d,
                               seq_len=N, block_b=block_b)

    row_spec = pl.BlockSpec((rows, E), lambda i, h: (i, 0))   # same block across h

    out2d = pl.pallas_call(
        kernel,
        out_shape=jax.ShapeDtypeStruct((b_pad * N, E), jnp.float32),
        grid_spec=pltpu.PrefetchScalarGridSpec(
            num_scalar_prefetch=0,
            grid=(num_blocks, num_heads),
            in_specs=[
                row_spec,                                                # x (resident over h)
                pl.BlockSpec((1, E, 3 * d), lambda i, h: (h, 0, 0)),     # per-head fused QKV
                pl.BlockSpec((1, 1, 3 * d), lambda i, h: (h, 0, 0)),
                pl.BlockSpec((1, d, E), lambda i, h: (h, 0, 0)),         # per-head W_o slice
                pl.BlockSpec((1, E), lambda i, h: (0, 0)),               # b_o
            ],
            out_specs=row_spec,
        ),
        compiler_params=pltpu.CompilerParams(
            dimension_semantics=("parallel", "arbitrary"),
            # Explicit VMEM budget (review): ~48 MiB is within v7x's 64 MiB
            # physical VMEM and leaves ample headroom on v5e/v6e's 128 MiB.
            vmem_limit_bytes=48 * 1024 * 1024,
        ),
    )(x2d, fused["w_qkv"], fused["b_qkv"], fused["w_o"], fused["b_o"])

    return out2d[: B * N].reshape(B, N, E)


def reference_mha(x, params, *, num_heads):
    """Pure-JAX (f32) reference mirroring the PyTorch forward (eval mode)."""
    B, N, E = x.shape
    d = E // num_heads

    def linear(x, w, b):  # PyTorch Linear: x @ W^T + b
        return x @ w.T + b

    q = linear(x, params["wq"], params["bq"]).reshape(B, N, num_heads, d).transpose(0, 2, 1, 3)
    k = linear(x, params["wk"], params["bk"]).reshape(B, N, num_heads, d).transpose(0, 2, 1, 3)
    v = linear(x, params["wv"], params["bv"]).reshape(B, N, num_heads, d).transpose(0, 2, 1, 3)

    energy = jnp.einsum("bhqd,bhkd->bhqk", q, k)
    att = jax.nn.softmax(energy / (E ** 0.5), axis=-1)
    out = jnp.einsum("bhal,bhlv->bhav", att, v)
    out = out.transpose(0, 2, 1, 3).reshape(B, N, E)
    return linear(out, params["wo"], params["bo"])


if __name__ == "__main__":
    B, N, E, H = 2, 8, 32, 4
    key = jax.random.PRNGKey(0)
    ks = jax.random.split(key, 10)

    bound = 1.0 / np.sqrt(E)  # mimic nn.Linear's uniform init range, deterministically
    params = {
        "wq": jax.random.uniform(ks[0], (E, E), jnp.float32, -bound, bound),
        "bq": jax.random.uniform(ks[1], (E,), jnp.float32, -bound, bound),
        "wk": jax.random.uniform(ks[2], (E, E), jnp.float32, -bound, bound),
        "bk": jax.random.uniform(ks[3], (E,), jnp.float32, -bound, bound),
        "wv": jax.random.uniform(ks[4], (E, E), jnp.float32, -bound, bound),
        "bv": jax.random.uniform(ks[5], (E,), jnp.float32, -bound, bound),
        "wo": jax.random.uniform(ks[6], (E, E), jnp.float32, -bound, bound),
        "bo": jax.random.uniform(ks[7], (E,), jnp.float32, -bound, bound),
    }
    x = jax.random.normal(ks[8], (B, N, E), jnp.float32)

    fused = prepare_attention_params(params, num_heads=H)   # hoisted out of the hot path
    out = multi_head_attention(x, fused, num_heads=H)
    out = jax.block_until_ready(out)

    ref = jax.block_until_ready(reference_mha(x, params, num_heads=H))
    # Tolerance accounts for bf16 MXU inputs (≈0.4% per matmul) and the EUP
    # approximate reciprocal (~1e-4) vs. the pure-f32 reference.
    np.testing.assert_allclose(np.asarray(out), np.asarray(ref), rtol=2e-2, atol=2e-2)

    print("KERNEL_OK")
</pallas_src>

<mosaic_0001>
module attributes {stable_mosaic.version = 11 : i64} {
  func.func @mha_kernel(%arg0: i32, %arg1: i32, %arg2: memref<8x32xbf16, #tpu.memory_space<vmem>>, %arg3: memref<1x32x24xbf16, #tpu.memory_space<vmem>>, %arg4: memref<1x1x24xf32, #tpu.memory_space<vmem>>, %arg5: memref<1x8x32xbf16, #tpu.memory_space<vmem>>, %arg6: memref<1x32xf32, #tpu.memory_space<vmem>>, %arg7: memref<8x32xf32, #tpu.memory_space<vmem>>) attributes {dimension_semantics = [#tpu.dimension_semantics<parallel>, #tpu.dimension_semantics<arbitrary>], iteration_bounds = array<i64: 2, 4>, scalar_prefetch = 0 : i64, scratch_operands = 0 : i64, tpu.core_type = #tpu.core_type<tc>, window_params = [{transform_indices = @transform_0, window_bounds = array<i64: 8, 32>}, {transform_indices = @transform_1, window_bounds = array<i64: 1, 32, 24>}, {transform_indices = @transform_2, window_bounds = array<i64: 1, 1, 24>}, {transform_indices = @transform_3, window_bounds = array<i64: 1, 8, 32>}, {pipeline_mode = #tpu.pipeline_mode<synchronous>, transform_indices = @transform_4, window_bounds = array<i64: 1, 32>}, {transform_indices = @transform_5, window_bounds = array<i64: 8, 32>}]} {
    %c0_i32 = arith.constant 0 : i32
    %0 = arith.cmpi eq, %arg1, %c0_i32 : i32
    %1 = arith.extui %0 : i1 to i32
    %c0_i32_0 = arith.constant 0 : i32
    %2 = arith.cmpi ne, %1, %c0_i32_0 : i32
    scf.if %2 {
      %cst_21 = arith.constant 0.000000e+00 : f32
      %42 = vector.broadcast %cst_21 : f32 to vector<8x32xf32>
      %c0_22 = arith.constant 0 : index
      %c0_23 = arith.constant 0 : index
      %43 = vector.load %arg7[%c0_22, %c0_23] : memref<8x32xf32, #tpu.memory_space<vmem>>, vector<8x32xf32>
      tpu.vector_store %arg7[%c0_22, %c0_23], %42 {strides = array<i32>} : memref<8x32xf32, #tpu.memory_space<vmem>>, vector<8x32xf32>,
    } else {
    }
    %c0 = arith.constant 0 : index
    %c0_1 = arith.constant 0 : index
    %3 = vector.load %arg2[%c0, %c0_1] : memref<8x32xbf16, #tpu.memory_space<vmem>>, vector<8x32xbf16>
    %c0_2 = arith.constant 0 : index
    %c0_3 = arith.constant 0 : index
    %c0_4 = arith.constant 0 : index
    %4 = vector.load %arg3[%c0_2, %c0_3, %c0_4] : memref<1x32x24xbf16, #tpu.memory_space<vmem>>, vector<1x32x24xbf16>
    %5 = vector.shape_cast %4 : vector<1x32x24xbf16> to vector<32x24xbf16>
    %cst = arith.constant dense<0.000000e+00> : vector<8x24xf32>
    %6 = tpu.matmul %3, %5, %cst {dimension_numbers = #tpu.dot_dimension_numbers<[1], [0], [0], [1], [0, 0, 1, 1], [], []>} : vector<8x32xbf16>, vector<32x24xbf16>, vector<8x24xf32> -> vector<8x24xf32>
    %c0_5 = arith.constant 0 : index
    %c0_6 = arith.constant 0 : index
    %c0_7 = arith.constant 0 : index
    %7 = vector.load %arg4[%c0_5, %c0_6, %c0_7] : memref<1x1x24xf32, #tpu.memory_space<vmem>>, vector<1x1x24xf32>
    %8 = vector.shape_cast %7 : vector<1x1x24xf32> to vector<1x24xf32>
    %9 = vector.broadcast %8 : vector<1x24xf32> to vector<8x24xf32>
    %10 = arith.addf %6, %9 : vector<8x24xf32>
    %11 = vector.extract_strided_slice %10 {offsets = [0, 0], sizes = [8, 8], strides = [1, 1]} : vector<8x24xf32> to vector<8x8xf32>
    %12 = vector.shape_cast %11 : vector<8x8xf32> to vector<1x8x8xf32>
    %13 = vector.extract_strided_slice %10 {offsets = [0, 8], sizes = [8, 8], strides = [1, 1]} : vector<8x24xf32> to vector<8x8xf32>
    %14 = vector.shape_cast %13 : vector<8x8xf32> to vector<1x8x8xf32>
    %15 = vector.extract_strided_slice %10 {offsets = [0, 16], sizes = [8, 8], strides = [1, 1]} : vector<8x24xf32> to vector<8x8xf32>
    %16 = vector.shape_cast %15 : vector<8x8xf32> to vector<1x8x8xf32>
    "tpu.trace_start"() <{level = 10 : i32, message = "bnd,bmd->bnm"}> : () -> ()
    %cst_8 = arith.constant dense<0.000000e+00> : vector<1x8x8xf32>
    %17 = tpu.matmul %12, %14, %cst_8 {dimension_numbers = #tpu.dot_dimension_numbers<[2], [2], [1], [1], [0, 0, 0, 1, 1, 1], [0], [0]>} : vector<1x8x8xf32>, vector<1x8x8xf32>, vector<1x8x8xf32> -> vector<1x8x8xf32>
    "tpu.trace_stop"() : () -> ()
    %cst_9 = arith.constant dense<0xFF800000> : vector<1x8xf32>
    %18 = vector.multi_reduction <maximumf>, %17, %cst_9 [2] : vector<1x8x8xf32> to vector<1x8xf32>
    %19 = vector.shape_cast %18 : vector<1x8xf32> to vector<1x8x1xf32>
    %20 = vector.broadcast %19 : vector<1x8x1xf32> to vector<1x8x8xf32>
    %21 = arith.subf %17, %20 : vector<1x8x8xf32>
    %22 = math.exp %21 : vector<1x8x8xf32>
    %cst_10 = arith.constant dense<0.000000e+00> : vector<1x8xf32>
    %23 = vector.multi_reduction <add>, %22, %cst_10 [2] : vector<1x8x8xf32> to vector<1x8xf32>
    %24 = vector.shape_cast %23 : vector<1x8xf32> to vector<1x8x1xf32>
    %25 = arith.truncf %22 : vector<1x8x8xf32> to vector<1x8x8xbf16>
    %26 = arith.truncf %16 : vector<1x8x8xf32> to vector<1x8x8xbf16>
    "tpu.trace_start"() <{level = 10 : i32, message = "bnm,bmd->bnd"}> : () -> ()
    %cst_11 = arith.constant dense<0.000000e+00> : vector<1x8x8xf32>
    %27 = tpu.matmul %25, %26, %cst_11 {dimension_numbers = #tpu.dot_dimension_numbers<[2], [1], [1], [2], [0, 0, 0, 1, 1, 2], [0], [0]>} : vector<1x8x8xbf16>, vector<1x8x8xbf16>, vector<1x8x8xf32> -> vector<1x8x8xf32>
    "tpu.trace_stop"() : () -> ()
    %28 = tpu.reciprocal %24 {approx = true} : vector<1x8x1xf32> -> vector<1x8x1xf32>
    %29 = vector.broadcast %28 : vector<1x8x1xf32> to vector<1x8x8xf32>
    %30 = arith.mulf %27, %29 : vector<1x8x8xf32>
    %31 = vector.shape_cast %30 : vector<1x8x8xf32> to vector<8x8xf32>
    %32 = arith.truncf %31 : vector<8x8xf32> to vector<8x8xbf16>
    %c0_12 = arith.constant 0 : index
    %c0_13 = arith.constant 0 : index
    %33 = vector.load %arg7[%c0_12, %c0_13] : memref<8x32xf32, #tpu.memory_space<vmem>>, vector<8x32xf32>
    %c0_14 = arith.constant 0 : index
    %c0_15 = arith.constant 0 : index
    %c0_16 = arith.constant 0 : index
    %34 = vector.load %arg5[%c0_14, %c0_15, %c0_16] : memref<1x8x32xbf16, #tpu.memory_space<vmem>>, vector<1x8x32xbf16>
    %35 = vector.shape_cast %34 : vector<1x8x32xbf16> to vector<8x32xbf16>
    %cst_17 = arith.constant dense<0.000000e+00> : vector<8x32xf32>
    %36 = tpu.matmul %32, %35, %cst_17 {dimension_numbers = #tpu.dot_dimension_numbers<[1], [0], [0], [1], [0, 0, 1, 1], [], []>} : vector<8x8xbf16>, vector<8x32xbf16>, vector<8x32xf32> -> vector<8x32xf32>
    %37 = arith.addf %33, %36 : vector<8x32xf32>
    %c0_18 = arith.constant 0 : index
    %c0_19 = arith.constant 0 : index
    %38 = vector.load %arg7[%c0_18, %c0_19] : memref<8x32xf32, #tpu.memory_space<vmem>>, vector<8x32xf32>
    tpu.vector_store %arg7[%c0_18, %c0_19], %37 {strides = array<i32>} : memref<8x32xf32, #tpu.memory_space<vmem>>, vector<8x32xf32>,
    %c3_i32 = arith.constant 3 : i32
    %39 = arith.cmpi eq, %arg1, %c3_i32 : i32
    %40 = arith.extui %39 : i1 to i32
    %c0_i32_20 = arith.constant 0 : i32
    %41 = arith.cmpi ne, %40, %c0_i32_20 : i32
    scf.if %41 {
      %c0_21 = arith.constant 0 : index
      %c0_22 = arith.constant 0 : index
      %42 = vector.load %arg7[%c0_21, %c0_22] : memref<8x32xf32, #tpu.memory_space<vmem>>, vector<8x32xf32>
      %c0_23 = arith.constant 0 : index
      %c0_24 = arith.constant 0 : index
      %43 = vector.load %arg6[%c0_23, %c0_24] : memref<1x32xf32, #tpu.memory_space<vmem>>, vector<1x32xf32>
      %44 = vector.broadcast %43 : vector<1x32xf32> to vector<8x32xf32>
      %45 = arith.addf %42, %44 : vector<8x32xf32>
      %c0_25 = arith.constant 0 : index
      %c0_26 = arith.constant 0 : index
      %46 = vector.load %arg7[%c0_25, %c0_26] : memref<8x32xf32, #tpu.memory_space<vmem>>, vector<8x32xf32>
      tpu.vector_store %arg7[%c0_25, %c0_26], %45 {strides = array<i32>} : memref<8x32xf32, #tpu.memory_space<vmem>>, vector<8x32xf32>,
    } else {
    }
    return
  }
  func.func @transform_0(%arg0: i32, %arg1: i32) -> (i32, i32) {
    %c0_i32 = arith.constant 0 : i32
    %c0_i32_0 = arith.constant 0 : i32
    return %arg0, %c0_i32 : i32, i32
  }
  func.func @transform_1(%arg0: i32, %arg1: i32) -> (i32, i32, i32) {
    %c0_i32 = arith.constant 0 : i32
    %c0_i32_0 = arith.constant 0 : i32
    %c0_i32_1 = arith.constant 0 : i32
    return %arg1, %c0_i32, %c0_i32_0 : i32, i32, i32
  }
  func.func @transform_2(%arg0: i32, %arg1: i32) -> (i32, i32, i32) {
    %c0_i32 = arith.constant 0 : i32
    %c0_i32_0 = arith.constant 0 : i32
    %c0_i32_1 = arith.constant 0 : i32
    return %arg1, %c0_i32, %c0_i32_0 : i32, i32, i32
  }
  func.func @transform_3(%arg0: i32, %arg1: i32) -> (i32, i32, i32) {
    %c0_i32 = arith.constant 0 : i32
    %c0_i32_0 = arith.constant 0 : i32
    %c0_i32_1 = arith.constant 0 : i32
    return %arg1, %c0_i32, %c0_i32_0 : i32, i32, i32
  }
  func.func @transform_4(%arg0: i32, %arg1: i32) -> (i32, i32) {
    %c0_i32 = arith.constant 0 : i32
    %c0_i32_0 = arith.constant 0 : i32
    %c0_i32_1 = arith.constant 0 : i32
    return %c0_i32, %c0_i32_0 : i32, i32
  }
  func.func @transform_5(%arg0: i32, %arg1: i32) -> (i32, i32) {
    %c0_i32 = arith.constant 0 : i32
    %c0_i32_0 = arith.constant 0 : i32
    return %arg0, %c0_i32 : i32, i32
  }
}

</mosaic_0001>

<bundles_post_ra>
// kernel: tpu_custom_call.1
= control target key start
LH: loop header
LB: loop body
LE: loop exit
PB: predicated region body
PF: predicated region fallthrough
CT: control target
= control target key end

     0   :  { %10 = vsyncpa [#allocation3], 0  ;;  %s1129_s0 = inlined_call_operand.vmem [shape: bf16[16,32], index: 0, kind: input, shape index: {}]   ;;  %s1130_s1 = inlined_call_operand.vmem [shape: bf16[4,32,24], index: 1, kind: input, shape index: {}]   ;;  %s1131_s2 = inlined_call_operand.vmem [shape: f32[4,1,24], index: 2, kind: input, shape index: {}]   ;;  %s1132_s3 = inlined_call_operand.vmem [shape: bf16[4,8,32], index: 3, kind: input, shape index: {}]   ;;  %s1133_s4 = inlined_call_operand.vmem [shape: f32[1,32], index: 4, kind: input, shape index: {}]   ;;  %s1134_s5 = inlined_call_operand.hbm [shape: f32[16,32], index: 5, kind: output, shape index: {}]  }
   0x1   :  { %12 = vsyncpa [#allocation3 + $0x1], 0  ;;  %s955_s18 = smov 0   ;;  %s957_s19 = smov 0  }
   0x2   :  { %s959_s20 = smov 0   ;;  %s961_s21 = smov 0  }
   0x3   :  { %s963_s22 = smov 0   ;;  %s965_s23 = smov 0  }
   0x4   :  { %s967_s24 = smov 0   ;;  %s969_s25 = smov 0  }
   0x5 LB: > { %1141 = sst [smem:[#allocation5_spill]] %s897_s20  ;;  %s681_s26 = sadd.s32 4294967295, %s917_s25   ;;  %s917_s25 = sphi %s969_s25, %s18_s25   ;;  %s913_s24 = sphi %s967_s24, %s1157_s24   ;;  %s909_s23 = sphi %s965_s23, %s1156_s23   ;;  %s905_s22 = sphi %s963_s22, %s1155_s22   ;;  %s901_s21 = sphi %s961_s21, %s1154_s21   ;;  %s897_s20 = sphi %s959_s20, %s1153_s20   ;;  %s893_s19 = sphi %s957_s19, %s1159_s19   ;;  %s889_s18 = sphi %s955_s18, %s1158_s18  }
   0x6   : > { %1142 = sst [smem:[#allocation6_spill]] %s909_s23  ;;  %s682_s27 = sadd.s32 4294967294, %s917_s25  }
   0x7   : > { %1143 = sst [smem:[#allocation7_spill]] %s913_s24  ;;  %s27_s28 = sadd.s32 1, %s909_s23 }
   0x8   : > { %p28_p0 = scmp.ge.s32.totalorder %s27_s28, 4  ;;  %s30_s29 = sadd.s32 1, %s913_s24 }
   0x9   : > { %p172_p1 = scmp.ne.s32.totalorder %s897_s20, %s893_s19  ;;  %p173_p2 = scmp.eq.s32.totalorder %s681_s26, 7 }
   0xa   : > { %s1161_s28 = smov (%p28_p0, %s27_s28), 0  ;;  %s1163_s29 = smov (!%p28_p0, %s30_s29), %s913_s24 }
   0xb   : > { %1144 = sst [smem:[#allocation8_spill]] %s1161_s28  ;;  %p1004_p3 = por %p173_p2, %p172_p1 }
   0xc   : > { %p178_p4 = scmp.ne.s32.totalorder %s893_s19, %s889_s18  ;;  %p32_p5 = scmp.ge.s32.totalorder %s1163_s29, 2 }
   0xd   : > { %p179_p6 = scmp.eq.s32.totalorder %s682_s27, 7  ;;  %p685_p7 = scmp.ge.s32.totalorder %s917_s25, 1 }
   0xe   : > { %p228_p8 = scmp.lt.s32.totalorder %s917_s25, 9  ;;  %s1165_s29 = smov (%p32_p5, %s1163_s29), 0 }
   0xf   : > { %1146 = sst [smem:[#allocation9_spill]] %s1165_s29  ;;  %p1014_p9 = por %p179_p6, %p178_p4 }
  0x10   : > { %p229_p10 = pnand %p685_p7, %p228_p8  ;;  %s159_s7 = ssub.s32 %s913_s24, %s1165_s29 }
  0x11   : > { %s1147_s6 = scalar_select %p1014_p9, 1, 0 }
  0x12   : > { %s162_s8 = sadd.s32 1, %s897_s20  ;;  %p160_p11 = scmp.eq.s32.totalorder %s159_s7, 0 }
  0x13   : > { %1148 = sst [smem:[#allocation10_spill]] %s1147_s6  ;;  %232 = sbr.rel (%p229_p10) target bundleno = 1214 (0x4be), region = 40 }
  0x14   : > { %s1022_s9 = scalar_select %p160_p11, %s897_s20, %s162_s8  }
  0x15   : > { %s1136_s10 = sand.u32 (!%p229_p10), 1, %s893_s19   ;;  %p267_p12 = scmp.lt.s32.totalorder (!%p229_p10), %s905_s22, 1 }
  0x16   : > { %1149 = sst [smem:[#allocation11_spill]] %s1022_s9  ;;  %s686_s11 = sshll.u32 (!%p229_p10), %s1136_s10, 3 }
  0x17   : > { %p271_p13 = scmp.lt.s32.totalorder (!%p229_p10), %s901_s21, 3  ;;  %s1048_s6 = scalar_lea.vmem (!%p229_p10), [#allocation2], %s686_s11 }
  0x18   : > { %p691_p0 = scmp.ne.s32.totalorder (!%p229_p10), %s901_s21, 0 }
  0x1a   : > { %s268_s12 = scalar_select %p267_p12, %s905_s22, 1 }
  0x1b   : > { %s1031_s13 = scalar_select %p271_p13, %s901_s21, 3 }
  0x1c   : > { %s687_s14 = sshll.u32 %s268_s12, 2  ;;  %287 = sbr.rel (%p691_p0) target bundleno = 35 (0x23), region = 44  ;;  %vm288_vm0 = vcmask (!%p691_p0), 261120   ;;  %v919_v0 = vmov (!%p691_p0), 0.0  }
  0x1d   : > { %s270_s17 = scalar_lea.vmem %s1129_s0, %s687_s14  ;;  %s706_s26 = sshll.u32 %s1031_s13, 4  ;;  %289 = vst.msk [vmem:[%s1048_s6] sm:$0xff] (!%p691_p0), %vm288_vm0, %v919_v0 }
  0x1e   : > { %s275_s8 = scalar_lea.vmem %s1130_s1, %s706_s26  ;;  %s278_s10 = scalar_lea.vmem %s1131_s2, %s1031_s13 }
  0x1f   : > { %s690_s24 = sshll.u32 %s1031_s13, 2 }
  0x20   : > { %s282_s20 = scalar_lea.vmem %s1132_s3, %s690_s24 }
  0x23 PF: > { %v817_v1 = vld [vmem:[%s275_s8] sm:$0xff]   ;;  %v920_v2 = vmov 0.0   ;;  %v818_v3 = vld [vmem:[%s275_s8 + $0x8] sm:$0xff]   ;;  %vm921_vm1 = vmmov 0   ;;  %vm314_vm2 = vcmask 261120   ;;  %vm453_vm3 = vcmask 1043456  }
  0x24   : > { %716 = vmatprep.subr.bf16.mxu0 %v920_v2  ;;  %724 = vmatprep.subr.mxu1 %v920_v2  ;;  %v290_v4 = vld [vmem:[%s270_s17] sm:$0xf]  ;;  %s922_s23 = smov 120   ;;  %s923_s24 = smov 112   ;;  %vm361_vm4 = vcmask 64512  }
  0x25   : > { %717 = vmatpush3.bf16.msra.mxu0 %v817_v1  ;;  %720 = vmatprep.mubr.msk.bf16.mxu0 %vm921_vm1, %v920_v2  ;;  %v501_v5 = vld [vmem:[%s282_s20] sm:$0xf]  ;;  %p700_p1 = scmp.ne.s32.totalorder %s901_s21, 3 }
  0x26   : > { %718 = vmatprep.subr.bf16.mxu0 %v920_v2  ;;  %726 = vmatprep.mubr.msk.f32.mxu1 %vm921_vm1, %v920_v2  ;;  %v506_v6 = vsel %vm453_vm3, %v501_v5, 0  ;;  %v692_v7 = vld [vmem:[%s278_s10] ss:$0 sm:$0xff] }
  0x27   : > { %v500_v34 = vld [vmem:[%s1048_s6] sm:$0xff] }
  0x28   : > { %v701_v41 = vld [vmem:[%s1133_s4] ss:$0 sm:$0xff] (!%p700_p1) }
  0x29   : > { %719 = vmatpush3.bf16.msra.mxu0 %v818_v3 }
  0x2a   : > { %735 = vmatprep.subr.bf16.mxu0 %v920_v2 }
  0x2c   : > { %721 = vmatmul.mubr.msk.bf16.vlgmr.msra.gmra.mrb[0].mxu0 %vm314_vm2, %v290_v4 }
  0x2d   : > { %737 = vmatprep.mubr.msk.bf16.mxu0 %vm921_vm1, %v920_v2  ;;  %736 = vmatpush3.bf16.msra.mxu0 %v506_v6 }
  0xff   : > { %v352_v8 = vpop.f32.mrb[0].mxu0 }
 0x100   : > { %v353_v9 = vadd.f32 %v692_v7, %v352_v8  ;;  %v722_v10 = vpop.f32.mrb[1].mxu0 }
 0x101   : > { %v355_v11 = vpop.f32.mrb[2].mxu0 }
 0x102   : > { %359 = vrot.lane.b32.xlu0 %v353_v9, %s922_s23  ;;  %v723_v12 = vpop.f32.mrb[3].mxu0  ;;  %v446_v13 = vpack.c.bf16 %v353_v9, %v353_v9 }
 0x104   : > { %448 = vrot.lane.b32.xlu1 %v446_v13, %s923_s24 }
 0x174   : > { %v360_v14 = vpop.permute.xlu0 %359 }
 0x175   : > { %725 = vmatpush3.xpose.msk.msra.mxu1 %vm361_vm4, %v360_v14 }
 0x176   : > { %v449_v15 = vpop.permute.xlu1 %448  ;;  %729 = vmatprep.subr.bf16.mxu1 %v920_v2 }
 0x177   : > { %v455_v16 = vsel %vm453_vm3, %v449_v15, 0 }
 0x178   : > { %727 = vmatmul.mubr.msk.f32.vlgmr.msra.gmra.mrb[0].mxu1 %vm361_vm4, %v353_v9 }
 0x179   : > { %730 = vmatpush3.bf16.msra.mxu1 %v455_v16  ;;  %731 = vmatprep.mubr.msk.bf16.mxu1 %vm921_vm1, %v920_v2 }
 0x24b   : > { %v432_v17 = vpop.f32.mrb[0].mxu1 }
 0x24c   : > { %v728_v18 = vpop.f32.mrb[1].mxu1  ;;  %v436_v19 = vsel %vm361_vm4, %v432_v17, -inf }
 0x24d   : > { %437 = vmax.xlane.f32.xlu0 %v436_v19 }
 0x2da   : > { %v438_v20 = vpop.xlane.xlu0 %437 }
 0x2db   : > { %v439_v21 = vsub.f32 %v432_v17, %v438_v20 }
 0x2dd   : > { %v440_v22 = vmul.f32 1.442695, %v439_v21 }
 0x2df   : > { %819 = vpow2.f32 %v440_v22 }
 0x2e9   : > { %v820_v23 = vpop.eup %819 }
 0x2ea   : > { %v442_v24 = vsel %vm361_vm4, %v820_v23, 0.0  ;;  %v445_v25 = vpack.c.bf16 %v820_v23, %v820_v23 }
 0x2eb   : > { %443 = vadd.xlane.f32.xlu1 %v442_v24 }
 0x2ec   : > { %732 = vmatmul.mubr.msk.bf16.vlgmr.msra.gmra.mrb[4].mxu1 %vm361_vm4, %v445_v25 }
 0x378   : > { %v444_v26 = vpop.xlane.xlu1 %443 }
 0x379   : > { %821 = vrcp.f32 %v444_v26 }
 0x383   : > { %v822_v27 = vpop.eup %821 }
 0x3bf   : > { %v491_v28 = vpop.f32.mrb[4].mxu1 }
 0x3c0   : > { %v498_v29 = vmul.f32 %v822_v27, %v491_v28  ;;  %v733_v30 = vpop.f32.mrb[5].mxu1 }
 0x3c1   : > { %v494_v31 = vpop.f32.mrb[6].mxu1 }
 0x3c2   : > { %v499_v32 = vpack.c.bf16 %v498_v29, %v498_v29  ;;  %v734_v33 = vpop.f32.mrb[7].mxu1 }
 0x3c4   : > { %738 = vmatmul.mubr.msk.bf16.vlgmr.msra.gmra.mrb[4].mxu0 %vm361_vm4, %v499_v32 }
 0x494   : > { %553 = sbr.rel (%p700_p1) target bundleno = 1189 (0x4a5), region = 48 }
 0x497   : > { %v542_v35 = vpop.f32.mrb[4].mxu0 }
 0x498   : > { %v548_v36 = vadd.f32 %v542_v35, %v500_v34  ;;  %v739_v37 = vpop.f32.mrb[5].mxu0 }
 0x499   : > { %v545_v38 = vpop.f32.mrb[6].mxu0 }
 0x49a   : > { %549 = vst.msk [vmem:[%s1048_s6] sm:$0xff] %vm314_vm2, %v548_v36  ;;  %v740_v39 = vpop.f32.mrb[7].mxu0 }
 0x4a1   : > { %v554_v40 = vld [vmem:[%s1048_s6] sm:$0xff] }
 0x4a2   : > { %v562_v42 = vadd.f32 %v701_v41, %v554_v40 }
 0x4a4   : > { %563 = vst.msk [vmem:[%s1048_s6] sm:$0xff] %vm314_vm2, %v562_v42 }
 0x4a5 PF: > { %s703_s29 = sshll.u32 %s905_s22, 7  ;;  %s578_s11 = sshll.u32 %s1048_s6, 4  ;;  %s579_s11 = int_to_ptr.vmem [resolvable:$true] %s578_s11 }
 0x4a6   : > { %s1079_s21 = scalar_lea.hbm %s1134_s5, %s703_s29  ;;  %s1150_s12 = sand.u32 1, %s893_s19  }
 0x4a7   : > { %s565_s13 = scalar_lea.sflag [#allocation3], %s1150_s12  ;;  %s823_s14 = scalar_lea.vmem %s579_s11, 128 }
 0x4a8   : > { %p824_p2 = scmp.ne.s32.totalorder %s579_s11, %s823_s14  ;;  %s924_s15 = smov [#allocation2]  }
 0x4a9   : > { %s827_s16 = sshll.u32 %s924_s15, 4  ;;  %s828_s16 = int_to_ptr.vmem [resolvable:$false] %s827_s16 }
 0x4aa   : > { %p825_p4 = pnand %p824_p2, %p1004_p3  ;;  %s829_s17 = scalar_lea.vmem %s828_s16, 256 }
 0x4ab   : > { %p830_p6 = scmp.lt.s32.totalorder %s579_s11, %s828_s16  ;;  %p831_p7 = scmp.lt.s32.totalorder %s829_s17, %s823_s14 }
 0x4ac   : > { %p826_p5 = pneg %p825_p4 }
 0x4ad   : > { %p832_p8 = por %p831_p7, %p830_p6 }
 0x4af   : > { %p833_p10 = pnand %p832_p8, %p826_p5 }
 0x4b1   : > { %836 = shalt.err (!%p833_p10)
}
 0x4b2   : > { %s837_s22 = scalar_lea.hbm %s1079_s21, 128  ;;  %s841_s27 = scalar_lea.hbm %s1134_s5, 256 }
 0x4b3   : > { %p838_p11 = scmp.ne.s32.totalorder %s1079_s21, %s837_s22  ;;  %p842_p0 = scmp.lt.u32.totalorder %s1079_s21, %s1134_s5 }
 0x4b4   : > { %p843_p1 = scmp.lt.u32.totalorder %s841_s27, %s837_s22  ;;  %p845_p4 = scmp.lt.u32.totalorder %s837_s22, %s1079_s21 }
 0x4b5   : > { %p839_p12 = pnand %p838_p11, %p1004_p3 }
 0x4b6   : > { %p844_p2 = por %p843_p1, %p842_p0 }
 0x4b7   : > { %p840_p13 = pneg %p839_p12 }
 0x4b8   : > { %p846_p5 = por %p845_p4, %p844_p2 }
 0x4ba   : > { %p847_p6 = pnand %p846_p5, %p840_p13 }
 0x4bc   : > { %850 = shalt.err (!%p847_p6)
}
 0x4bd   : > { %741 = dma.vmem_to_hbm [thread:$0]  (%p1004_p3), %s579_s11, 128, %s1079_s21, %s565_s13  }
 0x4be PF: > { %p747_p7 = scmp.ge.s32.totalorder %s917_s25, 2  ;;  %s590_s24 = sand.u32 1, %s889_s18  }
 0x4bf   : > { %s591_s20 = scalar_lea.sflag [#allocation3], %s590_s24 }
 0x4c0   : > { %p744_p8 = pnand %p747_p7, %p1014_p9 }
 0x4c2   : > { %884 = dma.done.wait (!%p744_p8), %s591_s20, 128  }
 0x4c3   : > { %886 = vsyncadd (!%p744_p8), %s591_s20, 4294967168  ;;  %s18_s25 = sadd.s32 1, %s917_s25   ;;  %s1152_s28 = sld [smem:[#allocation5_spill]] }
 0x4c4   : > { %p15_p10 = scmp.ge.s32.totalorder %s18_s25, 10   ;;  %s1153_s20 = sld [smem:[#allocation11_spill]] }
 0x4c5   : > { %s1154_s21 = sld [smem:[#allocation6_spill]]  ;;  %s1155_s22 = sld [smem:[#allocation7_spill]] }
 0x4c6   : > { %s1156_s23 = sld [smem:[#allocation8_spill]]  ;;  %s1157_s24 = sld [smem:[#allocation9_spill]] }
 0x4c7   : > { %s1158_s18 = smov %s893_s19  ;;  %17 = sbr.rel (!%p15_p10) target bundleno = 5 (0x5), region = 92 }
 0x4c9   : > { %s1159_s19 = smov %s1152_s28 }
 0x4ce   :  { %596 = vsyncpa [#allocation3], 1 }
 0x4cf   :  { %598 = vsyncpa [#allocation3 + $0x1], 1 }

</bundles_post_ra>
